<compile_context>
chip_gen: v7x
topology: tpu7x:2x2x1
jax: 0.10.0
libtpu: 0.0.40
codegen_flags: <defaults>
</compile_context>

<pallas_src>
import math
from functools import partial

import jax
import jax.numpy as jnp
import numpy as np
from jax import lax
from jax.experimental import pallas as pl
from jax.experimental.pallas import tpu as pltpu


# Contract the last dim of both operands (MXU "NT" mode, no transposed copies).
_NT = (((1,), (1,)), ((), ()))


# ----------------------------------------------------------------------------
# Kernel A (hoisted, grid over heads): r_head_k_pad[n] = pos_emb_pad @ W_n.T
# pos_emb_pad has an extra leading zero row, so r_head_k_pad row 0 is zero.
# ----------------------------------------------------------------------------
def _rnet_kernel(pos_ref, w_ref, out_ref):
    out_ref[0] = lax.dot_general(
        pos_ref[...], w_ref[...], _NT,
        preferred_element_type=jnp.float32).astype(out_ref.dtype)


# ----------------------------------------------------------------------------
# Kernel B (grid = (heads, batch)): fused  (AC + rel_shift(BD)) * scale
#   AC[i, j]      = sum_d (q[i] + r_w_bias) . k[j]
#   BD_pad[i, c]  = sum_d (q[i] + r_r_bias) . r_head_k_pad[c]   (col 0 == 0)
#   rel_shift: result[i, j] = BD_pad.flat[I + i*J + j]   (exact PyTorch semantics)
#            = row-shifted-copies(BD_pad)[i, (I - i) + j]
# ----------------------------------------------------------------------------
def _scores_kernel(q_ref, k_ref, rhk_ref, rwb_ref, rrb_ref, out_ref, *,
                   scale, qlen, klen, ncopies):
    q = q_ref[0, 0]            # (I, D)
    k = k_ref[0, 0]            # (J, D)
    rhk = rhk_ref[0]           # (J+1, D), row 0 is zero
    rwb = rwb_ref[0]           # (1, D)
    rrb = rrb_ref[0]           # (1, D)

    # content term
    ac = lax.dot_general(q + rwb, k, _NT,
                         preferred_element_type=jnp.float32)          # (I, J)

    # positional term against the zero-padded r_head_k -> column 0 is zero
    rr_q = q + rrb
    copies = [lax.dot_general(rr_q, rhk, _NT,
                              preferred_element_type=jnp.float32)]    # (I, J+1)
    if ncopies > 1:
        ri = lax.broadcasted_iota(jnp.int32, (qlen, qlen), 0)
        ci = lax.broadcasted_iota(jnp.int32, (qlen, qlen), 1)
        for t in range(1, ncopies):
            # P_t @ rr_q selects query row (i + t); rows past the end become 0
            # (never selected by the shear).  Exact 0/1 matmul -> no rounding.
            p_t = (ci == ri + t).astype(rr_q.dtype)
            q_t = jnp.dot(p_t, rr_q, preferred_element_type=jnp.float32)
            copies.append(lax.dot_general(q_t, rhk, _NT,
                                          preferred_element_type=jnp.float32))
    bd2 = copies[0] if ncopies == 1 else jnp.concatenate(copies, axis=-1)
    width = ncopies * (klen + 1)                                       # lanes of bd2

    # Per-row left rotate by a_i = I - i (a "shear"), done as a barrel shifter
    # of static lane rotations selected per sublane.  Exact, O(log2 I) stages.
    amount = qlen - lax.broadcasted_iota(jnp.int32, (qlen, 1), 0)      # (I, 1), in [1, I]
    cur = bd2
    for b in range(max(1, qlen.bit_length())):
        k_rot = (1 << b) % width
        if k_rot:
            rolled = jnp.concatenate([cur[:, k_rot:], cur[:, :k_rot]], axis=-1)
            cur = jnp.where((amount & (1 << b)) != 0, rolled, cur)
    bd_shifted = cur[:, :klen]                                         # (I, J)

    out_ref[0, 0] = ((ac + bd_shifted) * scale).astype(out_ref.dtype)


class RelativePositionalEncodingLayerPallas:
    def __init__(self, num_heads, num_hiddens, noise_max_length=32768,
                 max_time=10000, mlp_width=32, scale_factor=None,
                 train_length=None, key=None):
        self.num_heads = num_heads
        self.num_hiddens = num_hiddens
        self.noise_max_length = noise_max_length
        self.max_time = max_time
        self.scale_factor = scale_factor
        self.train_length = None if train_length is None else train_length // 2

        H = num_heads * num_hiddens
        k1, k2, k3 = jax.random.split(key, 3)
        # torch.randn(...) * 0.02
        self.r_w_bias = jax.random.normal(k1, (num_heads, num_hiddens),
                                          jnp.float32) * 0.02
        self.r_r_bias = jax.random.normal(k2, (num_heads, num_hiddens),
                                          jnp.float32) * 0.02
        # nn.Linear(H, H, bias=False): weight (out, in), uniform(-1/sqrt(H), 1/sqrt(H))
        bound = 1.0 / math.sqrt(H)
        self.r_net_weight = jax.random.uniform(k3, (H, H), jnp.float32,
                                               -bound, bound)
        # PositionalEmbedding buffer
        self.inv_freq = 1.0 / (max_time ** (jnp.arange(0.0, H, 2.0,
                                                       dtype=jnp.float32) / H))

    def __call__(self, queries, keys):
        # queries: (I, B, N, D), keys: (J, B, N, D)
        I, B, N, D = queries.shape
        J = keys.shape[0]
        H = N * D

        # Sinusoidal positional embedding, with an extra leading ZERO row so
        # that r_head_k_pad carries the rel-shift zero column for free.
        pos_seq = jnp.arange(J - 1, -1, -1, dtype=queries.dtype)
        sinusoid = pos_seq[:, None] * self.inv_freq[None, :]
        pos_emb = jnp.concatenate([jnp.sin(sinusoid), jnp.cos(sinusoid)], axis=-1)
        pos_pad = jnp.concatenate([jnp.zeros((1, H), pos_emb.dtype), pos_emb],
                                  axis=0)                              # (J+1, H)

        # --- Kernel A: r_head_k per head, computed once (hoisted) ------------
        r_head_k = pl.pallas_call(
            _rnet_kernel,
            out_shape=jax.ShapeDtypeStruct((N, J + 1, D), jnp.float32),
            grid_spec=pltpu.PrefetchScalarGridSpec(
                num_scalar_prefetch=0,
                grid=(N,),
                in_specs=[pl.BlockSpec((J + 1, H), lambda n: (0, 0)),
                          pl.BlockSpec((D, H), lambda n: (n, 0))],
                out_specs=pl.BlockSpec((1, J + 1, D), lambda n: (n, 0, 0)),
            ),
            compiler_params=pltpu.CompilerParams(
                dimension_semantics=("arbitrary",)),
        )(pos_pad, self.r_net_weight)

        # layout glue
        q_bnid = jnp.transpose(queries, (1, 2, 0, 3))                  # (B, N, I, D)
        k_bnjd = jnp.transpose(keys, (1, 2, 0, 3))                     # (B, N, J, D)
        rwb = self.r_w_bias[:, None, :]                                # (N, 1, D)
        rrb = self.r_r_bias[:, None, :]                                # (N, 1, D)

        # number of row-shifted BD copies needed so the shear never wraps
        ncopies = (I + J - 1) // (J + 1) + 1

        # --- Kernel B: fused scores + rel_shift + combine ---------------------
        attention = pl.pallas_call(
            partial(_scores_kernel, scale=float(self.scale_factor),
                    qlen=I, klen=J, ncopies=ncopies),
            out_shape=jax.ShapeDtypeStruct((B, N, I, J), jnp.float32),
            grid_spec=pltpu.PrefetchScalarGridSpec(
                num_scalar_prefetch=0,
                grid=(N, B),   # batch innermost: per-head operands fetched once per head
                in_specs=[
                    pl.BlockSpec((1, 1, I, D), lambda n, b: (b, n, 0, 0)),  # q
                    pl.BlockSpec((1, 1, J, D), lambda n, b: (b, n, 0, 0)),  # k
                    pl.BlockSpec((1, J + 1, D), lambda n, b: (n, 0, 0)),    # r_head_k
                    pl.BlockSpec((1, 1, D), lambda n, b: (n, 0, 0)),        # r_w_bias
                    pl.BlockSpec((1, 1, D), lambda n, b: (n, 0, 0)),        # r_r_bias
                ],
                out_specs=pl.BlockSpec((1, 1, I, J), lambda n, b: (b, n, 0, 0)),
            ),
            compiler_params=pltpu.CompilerParams(
                dimension_semantics=("parallel", "parallel")),
        )(q_bnid, k_bnjd, r_head_k, rwb, rrb)

        # (B, N, I, J) == PyTorch output layout after permute(2, 3, 0, 1)
        return attention


# ----------------------------------------------------------------------------
# Pure-JAX reference (mirrors the PyTorch forward exactly) for verification.
# ----------------------------------------------------------------------------
def reference_forward(layer, queries, keys):
    I, B, N, D = queries.shape
    J = keys.shape[0]
    pos_seq = jnp.arange(J - 1, -1, -1, dtype=queries.dtype)
    sinusoid = pos_seq[:, None] * layer.inv_freq[None, :]
    pos_emb = jnp.concatenate([jnp.sin(sinusoid), jnp.cos(sinusoid)], -1)  # (J, H)

    hp = jax.lax.Precision.HIGHEST
    rw_q = queries + layer.r_w_bias
    AC = jnp.einsum('ibnd,jbnd->ijbn', rw_q, keys, precision=hp)
    rr_q = queries + layer.r_r_bias
    r_head_k = jnp.dot(pos_emb, layer.r_net_weight.T,
                       precision=hp).reshape(J, N, D)
    BD = jnp.einsum('ibnd,jnd->ijbn', rr_q, r_head_k, precision=hp)
    # _rel_shift on (i, j, b, n)
    zero_pad = jnp.zeros((I, 1, B, N), BD.dtype)
    xp = jnp.concatenate([zero_pad, BD], axis=1).reshape(J + 1, I, B, N)
    BD = xp[1:].reshape(I, J, B, N)
    attn = (AC + BD) * layer.scale_factor
    return jnp.transpose(attn, (2, 3, 0, 1))                           # (B, N, I, J)


if __name__ == "__main__":
    num_heads = 4
    num_hiddens = 32
    seq_len = 8
    batch = 2

    key = jax.random.PRNGKey(0)
    k_params, k_q, k_k = jax.random.split(key, 3)

    layer = RelativePositionalEncodingLayerPallas(
        num_heads=num_heads,
        num_hiddens=num_hiddens,
        scale_factor=1.0 / math.sqrt(num_hiddens),
        train_length=2 * seq_len,
        key=k_params,
    )

    queries = jax.random.normal(k_q, (seq_len, batch, num_heads, num_hiddens),
                                jnp.float32)
    keys = jax.random.normal(k_k, (seq_len, batch, num_heads, num_hiddens),
                             jnp.float32)

    out = layer(queries, keys)
    out = jax.block_until_ready(out)

    ref = jax.block_until_ready(reference_forward(layer, queries, keys))
    np.testing.assert_allclose(np.asarray(out), np.asarray(ref),
                               rtol=5e-3, atol=5e-3)

    print("KERNEL_OK")
</pallas_src>

<mosaic_0001>
module attributes {stable_mosaic.version = 11 : i64} {
  func.func @_rnet_kernel(%arg0: i32, %arg1: memref<9x128xf32, #tpu.memory_space<vmem>>, %arg2: memref<32x128xf32, #tpu.memory_space<vmem>>, %arg3: memref<1x9x32xf32, #tpu.memory_space<vmem>>) attributes {dimension_semantics = [#tpu.dimension_semantics<arbitrary>], iteration_bounds = array<i64: 4>, scalar_prefetch = 0 : i64, scratch_operands = 0 : i64, tpu.core_type = #tpu.core_type<tc>, window_params = [{pipeline_mode = #tpu.pipeline_mode<synchronous>, transform_indices = @transform_0, window_bounds = array<i64: 9, 128>}, {transform_indices = @transform_1, window_bounds = array<i64: 32, 128>}, {transform_indices = @transform_2, window_bounds = array<i64: 1, 9, 32>}]} {
    %c0 = arith.constant 0 : index
    %c0_0 = arith.constant 0 : index
    %0 = vector.load %arg1[%c0, %c0_0] : memref<9x128xf32, #tpu.memory_space<vmem>>, vector<9x128xf32>
    %c0_1 = arith.constant 0 : index
    %c0_2 = arith.constant 0 : index
    %1 = vector.load %arg2[%c0_1, %c0_2] : memref<32x128xf32, #tpu.memory_space<vmem>>, vector<32x128xf32>
    %cst = arith.constant dense<0.000000e+00> : vector<9x32xf32>
    %2 = tpu.matmul %0, %1, %cst {dimension_numbers = #tpu.dot_dimension_numbers<[1], [1], [0], [0], [0, 0, 1, 0], [], []>} : vector<9x128xf32>, vector<32x128xf32>, vector<9x32xf32> -> vector<9x32xf32>
    %c0_3 = arith.constant 0 : index
    %c0_4 = arith.constant 0 : index
    %c0_5 = arith.constant 0 : index
    %3 = vector.load %arg3[%c0_3, %c0_4, %c0_5] : memref<1x9x32xf32, #tpu.memory_space<vmem>>, vector<1x9x32xf32>
    %4 = vector.shape_cast %3 : vector<1x9x32xf32> to vector<9x32xf32>
    %5 = vector.shape_cast %2 : vector<9x32xf32> to vector<1x9x32xf32>
    tpu.vector_store %arg3[%c0_3, %c0_4, %c0_5], %5 {strides = array<i32>} : memref<1x9x32xf32, #tpu.memory_space<vmem>>, vector<1x9x32xf32>,
    return
  }
  func.func @transform_0(%arg0: i32) -> (i32, i32) {
    %c0_i32 = arith.constant 0 : i32
    %c0_i32_0 = arith.constant 0 : i32
    %c0_i32_1 = arith.constant 0 : i32
    return %c0_i32, %c0_i32_0 : i32, i32
  }
  func.func @transform_1(%arg0: i32) -> (i32, i32) {
    %c0_i32 = arith.constant 0 : i32
    %c0_i32_0 = arith.constant 0 : i32
    return %arg0, %c0_i32 : i32, i32
  }
  func.func @transform_2(%arg0: i32) -> (i32, i32, i32) {
    %c0_i32 = arith.constant 0 : i32
    %c0_i32_0 = arith.constant 0 : i32
    %c0_i32_1 = arith.constant 0 : i32
    return %arg0, %c0_i32, %c0_i32_0 : i32, i32, i32
  }
}

</mosaic_0001>

<bundles_post_ra>
// kernel: tpu_custom_call.1
= control target key start
LH: loop header
LB: loop body
LE: loop exit
PB: predicated region body
PF: predicated region fallthrough
CT: control target
= control target key end

     0   :  { %7 = vsyncpa [#allocation3], 0  ;;  %s702_s0 = inlined_call_operand.hbm [shape: f32[9,128], index: 0, kind: input, shape index: {}]   ;;  %s703_s1 = inlined_call_operand.hbm [shape: f32[128,128], index: 1, kind: input, shape index: {}]   ;;  %s704_s2 = inlined_call_operand.vmem [shape: f32[4,9,32], index: 2, kind: output, shape index: {}]  }
   0x1   :  { %8 = vsyncpa [#allocation5], 0 }
   0x2   :  { %10 = vsyncpa [#allocation5 + $0x1], 0  ;;  %s554_s9 = smov 0   ;;  %s556_s10 = smov 0  }
   0x3   :  { %s558_s11 = smov 0   ;;  %s560_s12 = smov 0  }
   0x4 LB: > { %s573_s13 = sadd.s32 4294967295, %s533_s12   ;;  %p57_p0 = scmp.ne.s32.totalorder %s525_s10, %s521_s9  ;;  %s533_s12 = sphi %s560_s12, %s719_s12   ;;  %s529_s11 = sphi %s558_s11, %s718_s11   ;;  %s525_s10 = sphi %s556_s10, %s717_s10   ;;  %s521_s9 = sphi %s554_s9, %s716_s9  }
   0x5   : > { %p705_p1 = scmp.eq.s32.totalorder %s573_s13, 0  ;;  %p345_p2 = scmp.ge.s32.totalorder %s533_s12, 1 }
   0x6   : > { %p94_p3 = scmp.lt.s32.totalorder %s533_s12, 5  ;;  %s535_s16 = smov [#allocation2]  }
   0x7   : > { %p581_p4 = por %p705_p1, %p57_p0  ;;  %s106_s17 = sshll.u32 %s535_s16, 4  ;;  %s107_s17 = int_to_ptr.vmem [resolvable:$true] %s106_s17 }
   0x8   : > { %p585_p5 = pnand %p345_p2, %p94_p3  ;;  %s598_s19 = sadd.s32 1, %s533_s12  }
   0x9   : > { %s708_s14 = scalar_select %p581_p4, 1, 0 }
   0xa   : > { %s709_s15 = scalar_select %p585_p5, 1, 0 }
   0xb   : > { %p391_p6 = pneg %p585_p5  ;;  %s44_s20 = sadd.s32 1, %s529_s11 }
   0xc   : > { %s41_s21 = ssub.s32 %s533_s12, %s598_s19  ;;  %s437_s24 = scalar_lea.hbm %s702_s0, 256 }
   0xd   : > { %p593_p7 = pnand %p391_p6, %p705_p1  ;;  %p438_p8 = scmp.ne.s32.totalorder %s702_s0, %s437_s24 }
   0xe   : > { %p444_p12 = scmp.lt.u32.totalorder %s437_s24, %s702_s0 }
   0xf   : > { %p439_p9 = pneg %p593_p7 }
  0x11   : > { %p440_p10 = pnand %p439_p9, %p438_p8 }
  0x13   : > { %p441_p11 = pneg %p440_p10 }
  0x15   : > { %p446_p13 = pnand %p444_p12, %p441_p11 }
  0x17   : > { %449 = shalt.err (!%p446_p13)
}
  0x18   : > { %s450_s29 = scalar_lea.vmem %s107_s17, 256  ;;  %p458_p6 = scmp.lt.s32.totalorder %s107_s17, %s107_s17 }
  0x19   : > { %p451_p0 = scmp.ne.s32.totalorder %s107_s17, %s450_s29  ;;  %p459_p1 = scmp.lt.s32.totalorder %s450_s29, %s450_s29 }
  0x1b   : > { %p453_p2 = pnand %p451_p0, %p439_p9  ;;  %p460_p4 = por %p459_p1, %p458_p6 }
  0x1d   : > { %p454_p3 = pneg %p453_p2 }
  0x1f   : > { %p461_p5 = pnand %p460_p4, %p454_p3 }
  0x21   : > { %464 = shalt.err (!%p461_p5)
}
  0x22   : > { %s536_s30 = smov 128   ;;  %s537_s3 = smov 8  }
  0x23   : > { %394 = dma.hbm_to_vmem [thread:$0]  (!%p593_p7), %s702_s0, 256, %s107_s17, [#allocation3], %s536_s30, %s536_s30, %s537_s3  }
  0x24   : > { %p42_p1 = scmp.eq.s32.totalorder %s41_s21, 0  ;;  %p51_p4 = scmp.ne.s32.totalorder %s529_s11, %s525_s10 }
  0x25   : > { %p52_p5 = scmp.eq.s32.totalorder %s533_s12, 0  ;;  %p400_p8 = scmp.lt.s32.totalorder %s533_s12, 4 }
  0x26   : > { %s627_s6 = scalar_select %p42_p1, %s529_s11, %s44_s20  }
  0x27   : > { %p53_p9 = por %p52_p5, %p51_p4  ;;  %s120_s7 = sand.u32 1, %s529_s11  }
  0x28   : > { %s348_s8 = sshll.u32 %s120_s7, 5  ;;  %s358_s9 = sshll.u32 %s533_s12, 9 }
  0x29   : > { %s634_s18 = scalar_lea.hbm %s703_s1, %s358_s9  ;;  %s124_s17 = scalar_lea.vmem [#allocation4], %s348_s8 }
  0x2a   : > { %s131_s21 = sshll.u32 %s124_s17, 4  ;;  %p638_p7 = pnand %p400_p8, %p53_p9  ;;  %s636_s21 = int_to_ptr.vmem [resolvable:$true] %s131_s21 }
  0x2b   : > { %s642_s12 = scalar_lea.sflag [#allocation5], %s120_s7  ;;  %s465_s23 = scalar_lea.hbm %s634_s18, 512 }
  0x2c   : > { %p466_p10 = scmp.ne.s32.totalorder %s634_s18, %s465_s23  ;;  %p467_p11 = pneg %p638_p7 }
  0x2d   : > { %s470_s26 = scalar_lea.hbm %s703_s1, 2048  ;;  %p471_p0 = scmp.lt.u32.totalorder %s634_s18, %s703_s1 }
  0x2e   : > { %p468_p12 = pnand %p467_p11, %p466_p10  ;;  %p472_p2 = scmp.lt.u32.totalorder %s470_s26, %s465_s23 }
  0x2f   : > { %p474_p6 = scmp.lt.u32.totalorder %s465_s23, %s634_s18 }
  0x30   : > { %p469_p13 = pneg %p468_p12  ;;  %p473_p3 = por %p472_p2, %p471_p0 }
  0x32   : > { %p475_p1 = por %p474_p6, %p473_p3 }
  0x34   : > { %p476_p4 = pnand %p475_p1, %p469_p13 }
  0x36   : > { %479 = shalt.err (!%p476_p4)
}
  0x37   : > { %s480_s29 = scalar_lea.vmem %s636_s21, 512  ;;  %s538_s4 = smov [#allocation4]  }
  0x38   : > { %p481_p5 = scmp.ne.s32.totalorder %s636_s21, %s480_s29  ;;  %s485_s5 = sshll.u32 %s538_s4, 4  ;;  %s486_s5 = int_to_ptr.vmem [resolvable:$false] %s485_s5 }
  0x39   : > { %s487_s7 = scalar_lea.vmem %s486_s5, 1024  ;;  %p488_p10 = scmp.lt.s32.totalorder %s636_s21, %s486_s5 }
  0x3a   : > { %p483_p8 = pnand %p481_p5, %p467_p11  ;;  %p489_p12 = scmp.lt.s32.totalorder %s487_s7, %s480_s29 }
  0x3c   : > { %p484_p9 = pneg %p483_p8  ;;  %p490_p0 = por %p489_p12, %p488_p10 }
  0x3e   : > { %p491_p2 = pnand %p490_p0, %p484_p9 }
  0x40   : > { %494 = shalt.err (!%p491_p2)
}
  0x41   : > { %398 = dma.hbm_to_vmem [thread:$0]  (!%p638_p7), %s634_s18, 512, %s636_s21, %s642_s12, %s536_s30, %s536_s30, %s537_s3  }
  0x42   : > { %p712_p11 = scmp.ne.s32.totalorder %s709_s15, 0 }
  0x43   : > { %p713_p13 = scmp.eq.s32.totalorder (!%p712_p11), %s573_s13, 0 }
  0x44   : > { %143 = sbr.rel (%p712_p11) target bundleno = 313 (0x139), region = 28 }
  0x4b   : > { %512 = dma.done.wait (%p713_p13), [#allocation3], 256   ;;  %p714_p3 = pmov %p713_p13 }
  0x4c   : > { %s149_s8 = sand.u32 1, %s525_s10   ;;  %p715_p6 = scmp.ne.s32.totalorder %s708_s14, 0 }
  0x4d   : > { %514 = vsyncadd (%p714_p3), [#allocation3], 4294967040  ;;  %s353_s9 = sshll.u32 %s149_s8, 5  ;;  %s150_s16 = scalar_lea.sflag [#allocation5], %s149_s8 }
  0x4e   : > { %s153_s22 = scalar_lea.vmem [#allocation4], %s353_s9 }
  0x4f   : > { %516 = dma.done.wait (%p715_p6), %s150_s16, 512  }
  0x50   : > { %518 = vsyncadd (%p715_p6), %s150_s16, 4294966784  ;;  %v182_v0 = vld [vmem:[%s153_s22] sm:$0xff]  ;;  %v183_v1 = vld [vmem:[%s153_s22 + $0x8] sm:$0xff]  ;;  %p175_p7 = scmp.lt.s32.totalorder %s573_s13, 3  ;;  %vm263_vm0 = vcmask 253952   ;;  %vm261_vm1 = vcmask 261120  }
  0x51   : > { %v184_v2 = vld [vmem:[%s153_s22 + $0x10] sm:$0xff]  ;;  %v377_v3 = vpack.c.bf16 %v183_v1, %v182_v0  ;;  %v185_v4 = vld [vmem:[%s153_s22 + $0x18] sm:$0xff] }
  0x52   : > { %v180_v5 = vld [vmem:[#allocation2] sm:$0xff]  ;;  %v381_v6 = vpack.c.bf16 %v185_v4, %v184_v2  ;;  %v181_v7 = vld [vmem:[#allocation2 + $0x8] sm:$0x1]  ;;  %s721_s13 = smov (!%p175_p7, %s573_s13), 3 }
  0x53   : > { %374 = vmatprep.mubr.f32.mxu0 %v180_v5  ;;  %378 = vmatprep.subr.bf16.mxu0 %v377_v3  ;;  %s359_s14 = sshll.u32 %s721_s13, 4 }
  0x54   : > { %380 = vmatpush3.bf16.xpose.msra.mxu0 %v377_v3  ;;  %s179_s3 = scalar_lea.vmem %s704_s2, %s359_s14 }
  0x55   : > { %382 = vmatprep.subr.bf16.mxu0 %v381_v6 }
  0x5c   : > { %384 = vmatpush3.bf16.xpose.msra.mxu0 %v381_v6 }
  0x63   : > { %375 = vmatmul.mubr.f32.vlgmr.msra.gmra.mrb[0].mxu0 %v181_v7 }
 0x136   : > { %v376_v8 = vpop.f32.mrb[0].mxu0 }
 0x137   : > { %264 = vst.msk [vmem:[%s179_s3 + $0x8] sm:$0x1] %vm263_vm0, %v376_v8  ;;  %v252_v9 = vpop.f32.mrb[1].mxu0 }
 0x138   : > { %262 = vst.msk [vmem:[%s179_s3] sm:$0xff] %vm261_vm1, %v252_v9 }
 0x139 PF: > { %p13_p1 = scmp.ge.s32.totalorder %s598_s19, 6   ;;  %s716_s9 = smov %s525_s10 }
 0x13a   : > { %s717_s10 = smov %s529_s11  ;;  %s718_s11 = smov %s627_s6 }
 0x13b   : > { %s719_s12 = smov %s598_s19  ;;  %15 = sbr.rel (!%p13_p1) target bundleno = 4 (0x4), region = 73 }
 0x142   :  { %286 = vsyncpa [#allocation3], 1 }
 0x143   :  { %288 = vsyncpa [#allocation3 + $0x1], 1 }
 0x144   :  { %289 = vsyncpa [#allocation5], 1 }
 0x145   :  { %291 = vsyncpa [#allocation5 + $0x1], 1 }

</bundles_post_ra>
